<compile_context>
chip_gen: v7x
topology: tpu7x:2x2x1
jax: 0.10.0
libtpu: 0.0.40
codegen_flags: <defaults>
</compile_context>

<pallas_src>
import jax
import jax.numpy as jnp
from jax.experimental import pallas as pl
from jax.experimental.pallas import tpu as pltpu


NEG_SLOPE = 0.01  # nn.LeakyReLU() default


def _leaky_relu(h):
    return jnp.where(h > 0, h, NEG_SLOPE * h)


def _round_up(x, m):
    return (x + m - 1) // m * m


def f_func_kernel(x_ref,
                  w1_ref, b1_ref,
                  w2_ref, b2_ref,
                  w3_ref, b3_ref,
                  w4_ref, b4_ref,
                  w5_ref, b5_ref,
                  o_ref):
    """Whole 5-layer MLP hot path in one kernel.

    x_ref : (2, bm, dim)       pair view of the batch (row i pairs x[i] with x[half+i])
    w1_ref: (2, dim, hid)      fc_1 weight split into the two halves of its K dim
    w2..w4: (hid, hid), biases (1, hid) f32
    w5_ref: (1, hid)           fc_5 weight as a row (compute dtype)
    b5_ref: (1, 1) f32
    o_ref : (bm, 1) f32
    """
    cdt = w1_ref.dtype  # compute dtype for MXU operands (bf16 or f32)

    z_top = x_ref[0].astype(cdt)   # (bm, dim)
    z_bot = x_ref[1].astype(cdt)   # (bm, dim)

    # fc_1 on the implicit concat [z_top | z_bot] without materializing it:
    h = (jnp.dot(z_top, w1_ref[0], preferred_element_type=jnp.float32)
         + jnp.dot(z_bot, w1_ref[1], preferred_element_type=jnp.float32)
         + b1_ref[...])
    h = _leaky_relu(h)

    # fc_2 .. fc_4 (unrolled; weights stay resident in VMEM, constant index maps)
    for w_ref, b_ref in ((w2_ref, b2_ref), (w3_ref, b3_ref), (w4_ref, b4_ref)):
        h = _leaky_relu(
            jnp.dot(h.astype(cdt), w_ref[...],
                    preferred_element_type=jnp.float32) + b_ref[...])

    # fc_5: hid -> 1 as VPU multiply + lane reduction (avoids an N=1 MXU pass).
    out = jnp.sum(h * w5_ref[...].astype(jnp.float32),
                  axis=-1, keepdims=True) + b5_ref[...]
    o_ref[...] = out.astype(o_ref.dtype)


def f_func_forward(x, params, *, block_rows=512, use_bf16=True):
    """x: (B, dim) float32. Returns (B//2, 1) float32."""
    B, dim = x.shape
    assert B % 2 == 0, "batch must be even (torch module pairs first/second halves)"
    half = B // 2

    (w1, b1), (w2, b2), (w3, b3), (w4, b4), (w5, b5) = params
    in_dim, hid = w1.shape
    out_dim = w5.shape[1]
    assert in_dim == 2 * dim and out_dim == 1

    compute_dtype = jnp.bfloat16 if use_bf16 else jnp.float32
    row_align = 16 if use_bf16 else 8   # bf16 packs 16 rows per sublane vreg

    # ---- pick the row tile (bm): big tiles amortize grid-step overhead and fill
    #      the MXU M dimension; prefer >= 2 grid steps so v7x's 2 TCs both get work.
    bm = min(block_rows, _round_up(half, row_align))
    bm = _round_up(bm, row_align)
    if (half % bm == 0 and half // bm == 1
            and half >= 2 * row_align and (half // 2) % row_align == 0):
        bm = half // 2
    half_pad = _round_up(half, bm)
    grid = (half_pad // bm,)

    # Pair view of x: (2, half, dim). Row-major contiguous -> free reshape, no HBM
    # round-trip for a concatenated (half, 2*dim) buffer.
    x3 = x.reshape(2, half, dim)
    if half_pad != half:
        x3 = jnp.pad(x3, ((0, 0), (0, half_pad - half), (0, 0)))

    # Weights: cast once to the compute dtype (halves DMA traffic in bf16 mode).
    w1r = w1.reshape(2, dim, hid).astype(compute_dtype)   # split fc_1 weight
    w2c = w2.astype(compute_dtype)
    w3c = w3.astype(compute_dtype)
    w4c = w4.astype(compute_dtype)
    w5row = w5.reshape(1, hid).astype(compute_dtype)       # fc_5 weight as a row
    # Biases stay f32 (added post-accumulation).

    def const_spec(shape):
        # Constant index map: DMA'd once, stays resident across the grid.
        return pl.BlockSpec(shape, lambda i: tuple(0 for _ in shape))

    out = pl.pallas_call(
        f_func_kernel,
        out_shape=jax.ShapeDtypeStruct((half_pad, out_dim), jnp.float32),
        grid_spec=pltpu.PrefetchScalarGridSpec(
            num_scalar_prefetch=0,
            grid=grid,
            in_specs=[
                pl.BlockSpec((2, bm, dim), lambda i: (0, i, 0)),   # x pair tiles
                const_spec((2, dim, hid)), const_spec((1, hid)),   # fc_1
                const_spec((hid, hid)),    const_spec((1, hid)),   # fc_2
                const_spec((hid, hid)),    const_spec((1, hid)),   # fc_3
                const_spec((hid, hid)),    const_spec((1, hid)),   # fc_4
                const_spec((1, hid)),      const_spec((1, 1)),     # fc_5 (row, bias)
            ],
            out_specs=pl.BlockSpec((bm, out_dim), lambda i: (i, 0)),
        ),
        compiler_params=pltpu.CompilerParams(
            dimension_semantics=("parallel",),
            vmem_limit_bytes=64 * 1024 * 1024,   # headroom for large row tiles
        ),
    )(x3, w1r, b1, w2c, b2, w3c, b3, w4c, b4, w5row, b5)

    if half_pad != half:
        out = out[:half]
    return out


def init_params(key, in_dim, hidden_dim, out_dim):
    """Mimics PyTorch's default U(-1/sqrt(fan_in), 1/sqrt(fan_in)) init.

    Weights stored as [in, out]; biases as [1, out]."""
    dims = [(in_dim, hidden_dim),
            (hidden_dim, hidden_dim),
            (hidden_dim, hidden_dim),
            (hidden_dim, hidden_dim),
            (hidden_dim, out_dim)]
    params = []
    for (fi, fo) in dims:
        key, kw, kb = jax.random.split(key, 3)
        bound = 1.0 / jnp.sqrt(fi)
        w = jax.random.uniform(kw, (fi, fo), jnp.float32, -bound, bound)
        b = jax.random.uniform(kb, (1, fo), jnp.float32, -bound, bound)
        params.append((w, b))
    return params


def reference_forward(x, params, compute_dtype=jnp.float32):
    """Pure-JAX reference of the torch forward (dropout p=0 -> identity).

    `compute_dtype` mirrors the kernel's matmul operand dtype (f32 accumulation)."""
    B, dim = x.shape
    half = B // 2
    z = jnp.concatenate([x[:half, :], x[half:, :]], axis=1)
    h = z
    for (w, b) in params[:-1]:
        h = jnp.dot(h.astype(compute_dtype), w.astype(compute_dtype),
                    preferred_element_type=jnp.float32,
                    precision=jax.lax.Precision.HIGHEST) + b
        h = jnp.where(h > 0, h, NEG_SLOPE * h)
    w5, b5 = params[-1]
    w5_eff = w5.astype(compute_dtype).astype(jnp.float32)
    return jnp.dot(h, w5_eff, preferred_element_type=jnp.float32,
                   precision=jax.lax.Precision.HIGHEST) + b5


if __name__ == "__main__":
    # Small shapes consistent with the module: per-sample dim=4, m=2 -> fc_1 in = 8,
    # hidden e_dim = 128 (module default 1024, kept small here), batch = 128
    # -> kernel operates on (64, 8) pair rows, tiled 2 x 32 rows.
    batch = 128
    in_dim = 4      # per-sample feature dim (the module's `in_dim`)
    m = 2
    e_dim = 128     # hidden width
    out_dim = 1

    key = jax.random.PRNGKey(0)
    kx, kp = jax.random.split(key)
    x = jax.random.normal(kx, (batch, in_dim), jnp.float32)
    params = init_params(kp, in_dim * m, e_dim, out_dim)

    # bf16-operand / f32-accumulate path (recommended on v6e/v7x).
    y = f_func_forward(x, params, block_rows=512, use_bf16=True)
    y = jax.block_until_ready(y)
    y_ref_bf16 = reference_forward(x, params, compute_dtype=jnp.bfloat16)
    assert y.shape == (batch // 2, out_dim), y.shape
    assert jnp.allclose(y, y_ref_bf16, atol=2e-3, rtol=2e-3), (
        float(jnp.max(jnp.abs(y - y_ref_bf16))))

    # f32 path, tight check against the f32 reference.
    y32 = jax.block_until_ready(f_func_forward(x, params, use_bf16=False))
    y32_ref = reference_forward(x, params, compute_dtype=jnp.float32)
    assert jnp.allclose(y32, y32_ref, atol=1e-4, rtol=1e-4), (
        float(jnp.max(jnp.abs(y32 - y32_ref))))

    print("KERNEL_OK")
</pallas_src>

<mosaic_0001>
module attributes {stable_mosaic.version = 11 : i64} {
  func.func @f_func_kernel(%arg0: i32, %arg1: memref<2x32x4xf32, #tpu.memory_space<vmem>>, %arg2: memref<2x4x128xbf16, #tpu.memory_space<vmem>>, %arg3: memref<1x128xf32, #tpu.memory_space<vmem>>, %arg4: memref<128x128xbf16, #tpu.memory_space<vmem>>, %arg5: memref<1x128xf32, #tpu.memory_space<vmem>>, %arg6: memref<128x128xbf16, #tpu.memory_space<vmem>>, %arg7: memref<1x128xf32, #tpu.memory_space<vmem>>, %arg8: memref<128x128xbf16, #tpu.memory_space<vmem>>, %arg9: memref<1x128xf32, #tpu.memory_space<vmem>>, %arg10: memref<1x128xbf16, #tpu.memory_space<vmem>>, %arg11: memref<1x1xf32, #tpu.memory_space<vmem>>, %arg12: memref<32x1xf32, #tpu.memory_space<vmem>>) attributes {dimension_semantics = [#tpu.dimension_semantics<parallel>], iteration_bounds = array<i64: 2>, scalar_prefetch = 0 : i64, scratch_operands = 0 : i64, tpu.core_type = #tpu.core_type<tc>, window_params = [{transform_indices = @transform_0, window_bounds = array<i64: 2, 32, 4>}, {pipeline_mode = #tpu.pipeline_mode<synchronous>, transform_indices = @transform_1, window_bounds = array<i64: 2, 4, 128>}, {pipeline_mode = #tpu.pipeline_mode<synchronous>, transform_indices = @transform_2, window_bounds = array<i64: 1, 128>}, {pipeline_mode = #tpu.pipeline_mode<synchronous>, transform_indices = @transform_3, window_bounds = array<i64: 128, 128>}, {pipeline_mode = #tpu.pipeline_mode<synchronous>, transform_indices = @transform_4, window_bounds = array<i64: 1, 128>}, {pipeline_mode = #tpu.pipeline_mode<synchronous>, transform_indices = @transform_5, window_bounds = array<i64: 128, 128>}, {pipeline_mode = #tpu.pipeline_mode<synchronous>, transform_indices = @transform_6, window_bounds = array<i64: 1, 128>}, {pipeline_mode = #tpu.pipeline_mode<synchronous>, transform_indices = @transform_7, window_bounds = array<i64: 128, 128>}, {pipeline_mode = #tpu.pipeline_mode<synchronous>, transform_indices = @transform_8, window_bounds = array<i64: 1, 128>}, {pipeline_mode = #tpu.pipeline_mode<synchronous>, transform_indices = @transform_9, window_bounds = array<i64: 1, 128>}, {pipeline_mode = #tpu.pipeline_mode<synchronous>, transform_indices = @transform_10, window_bounds = array<i64: 1, 1>}, {transform_indices = @transform_11, window_bounds = array<i64: 32, 1>}]} {
    %c0 = arith.constant 0 : index
    %c0_0 = arith.constant 0 : index
    %c0_1 = arith.constant 0 : index
    %0 = vector.load %arg1[%c0, %c0_0, %c0_1] : memref<2x32x4xf32, #tpu.memory_space<vmem>>, vector<1x32x4xf32>
    %1 = vector.shape_cast %0 : vector<1x32x4xf32> to vector<32x4xf32>
    %2 = arith.truncf %1 : vector<32x4xf32> to vector<32x4xbf16>
    %c1 = arith.constant 1 : index
    %c0_2 = arith.constant 0 : index
    %c0_3 = arith.constant 0 : index
    %3 = vector.load %arg1[%c1, %c0_2, %c0_3] : memref<2x32x4xf32, #tpu.memory_space<vmem>>, vector<1x32x4xf32>
    %4 = vector.shape_cast %3 : vector<1x32x4xf32> to vector<32x4xf32>
    %5 = arith.truncf %4 : vector<32x4xf32> to vector<32x4xbf16>
    %c0_4 = arith.constant 0 : index
    %c0_5 = arith.constant 0 : index
    %c0_6 = arith.constant 0 : index
    %6 = vector.load %arg2[%c0_4, %c0_5, %c0_6] : memref<2x4x128xbf16, #tpu.memory_space<vmem>>, vector<1x4x128xbf16>
    %7 = vector.shape_cast %6 : vector<1x4x128xbf16> to vector<4x128xbf16>
    %cst = arith.constant dense<0.000000e+00> : vector<32x128xf32>
    %8 = tpu.matmul %2, %7, %cst {dimension_numbers = #tpu.dot_dimension_numbers<[1], [0], [0], [1], [0, 0, 1, 1], [], []>} : vector<32x4xbf16>, vector<4x128xbf16>, vector<32x128xf32> -> vector<32x128xf32>
    %c1_7 = arith.constant 1 : index
    %c0_8 = arith.constant 0 : index
    %c0_9 = arith.constant 0 : index
    %9 = vector.load %arg2[%c1_7, %c0_8, %c0_9] : memref<2x4x128xbf16, #tpu.memory_space<vmem>>, vector<1x4x128xbf16>
    %10 = vector.shape_cast %9 : vector<1x4x128xbf16> to vector<4x128xbf16>
    %cst_10 = arith.constant dense<0.000000e+00> : vector<32x128xf32>
    %11 = tpu.matmul %5, %10, %cst_10 {dimension_numbers = #tpu.dot_dimension_numbers<[1], [0], [0], [1], [0, 0, 1, 1], [], []>} : vector<32x4xbf16>, vector<4x128xbf16>, vector<32x128xf32> -> vector<32x128xf32>
    %12 = arith.addf %8, %11 : vector<32x128xf32>
    %c0_11 = arith.constant 0 : index
    %c0_12 = arith.constant 0 : index
    %13 = vector.load %arg3[%c0_11, %c0_12] : memref<1x128xf32, #tpu.memory_space<vmem>>, vector<1x128xf32>
    %14 = vector.broadcast %13 : vector<1x128xf32> to vector<32x128xf32>
    %15 = arith.addf %12, %14 : vector<32x128xf32>
    %cst_13 = arith.constant 0.000000e+00 : f32
    %16 = vector.broadcast %cst_13 : f32 to vector<32x128xf32>
    %17 = arith.cmpf ogt, %15, %16 : vector<32x128xf32>
    %cst_14 = arith.constant 0.00999999977 : f32
    %18 = vector.broadcast %cst_14 : f32 to vector<32x128xf32>
    %19 = arith.mulf %18, %15 : vector<32x128xf32>
    %20 = arith.select %17, %15, %19 : vector<32x128xi1>, vector<32x128xf32>
    %21 = arith.truncf %20 : vector<32x128xf32> to vector<32x128xbf16>
    %c0_15 = arith.constant 0 : index
    %c0_16 = arith.constant 0 : index
    %22 = vector.load %arg4[%c0_15, %c0_16] : memref<128x128xbf16, #tpu.memory_space<vmem>>, vector<128x128xbf16>
    %cst_17 = arith.constant dense<0.000000e+00> : vector<32x128xf32>
    %23 = tpu.matmul %21, %22, %cst_17 {dimension_numbers = #tpu.dot_dimension_numbers<[1], [0], [0], [1], [0, 0, 1, 1], [], []>} : vector<32x128xbf16>, vector<128x128xbf16>, vector<32x128xf32> -> vector<32x128xf32>
    %c0_18 = arith.constant 0 : index
    %c0_19 = arith.constant 0 : index
    %24 = vector.load %arg5[%c0_18, %c0_19] : memref<1x128xf32, #tpu.memory_space<vmem>>, vector<1x128xf32>
    %25 = vector.broadcast %24 : vector<1x128xf32> to vector<32x128xf32>
    %26 = arith.addf %23, %25 : vector<32x128xf32>
    %cst_20 = arith.constant 0.000000e+00 : f32
    %27 = vector.broadcast %cst_20 : f32 to vector<32x128xf32>
    %28 = arith.cmpf ogt, %26, %27 : vector<32x128xf32>
    %cst_21 = arith.constant 0.00999999977 : f32
    %29 = vector.broadcast %cst_21 : f32 to vector<32x128xf32>
    %30 = arith.mulf %29, %26 : vector<32x128xf32>
    %31 = arith.select %28, %26, %30 : vector<32x128xi1>, vector<32x128xf32>
    %32 = arith.truncf %31 : vector<32x128xf32> to vector<32x128xbf16>
    %c0_22 = arith.constant 0 : index
    %c0_23 = arith.constant 0 : index
    %33 = vector.load %arg6[%c0_22, %c0_23] : memref<128x128xbf16, #tpu.memory_space<vmem>>, vector<128x128xbf16>
    %cst_24 = arith.constant dense<0.000000e+00> : vector<32x128xf32>
    %34 = tpu.matmul %32, %33, %cst_24 {dimension_numbers = #tpu.dot_dimension_numbers<[1], [0], [0], [1], [0, 0, 1, 1], [], []>} : vector<32x128xbf16>, vector<128x128xbf16>, vector<32x128xf32> -> vector<32x128xf32>
    %c0_25 = arith.constant 0 : index
    %c0_26 = arith.constant 0 : index
    %35 = vector.load %arg7[%c0_25, %c0_26] : memref<1x128xf32, #tpu.memory_space<vmem>>, vector<1x128xf32>
    %36 = vector.broadcast %35 : vector<1x128xf32> to vector<32x128xf32>
    %37 = arith.addf %34, %36 : vector<32x128xf32>
    %cst_27 = arith.constant 0.000000e+00 : f32
    %38 = vector.broadcast %cst_27 : f32 to vector<32x128xf32>
    %39 = arith.cmpf ogt, %37, %38 : vector<32x128xf32>
    %cst_28 = arith.constant 0.00999999977 : f32
    %40 = vector.broadcast %cst_28 : f32 to vector<32x128xf32>
    %41 = arith.mulf %40, %37 : vector<32x128xf32>
    %42 = arith.select %39, %37, %41 : vector<32x128xi1>, vector<32x128xf32>
    %43 = arith.truncf %42 : vector<32x128xf32> to vector<32x128xbf16>
    %c0_29 = arith.constant 0 : index
    %c0_30 = arith.constant 0 : index
    %44 = vector.load %arg8[%c0_29, %c0_30] : memref<128x128xbf16, #tpu.memory_space<vmem>>, vector<128x128xbf16>
    %cst_31 = arith.constant dense<0.000000e+00> : vector<32x128xf32>
    %45 = tpu.matmul %43, %44, %cst_31 {dimension_numbers = #tpu.dot_dimension_numbers<[1], [0], [0], [1], [0, 0, 1, 1], [], []>} : vector<32x128xbf16>, vector<128x128xbf16>, vector<32x128xf32> -> vector<32x128xf32>
    %c0_32 = arith.constant 0 : index
    %c0_33 = arith.constant 0 : index
    %46 = vector.load %arg9[%c0_32, %c0_33] : memref<1x128xf32, #tpu.memory_space<vmem>>, vector<1x128xf32>
    %47 = vector.broadcast %46 : vector<1x128xf32> to vector<32x128xf32>
    %48 = arith.addf %45, %47 : vector<32x128xf32>
    %cst_34 = arith.constant 0.000000e+00 : f32
    %49 = vector.broadcast %cst_34 : f32 to vector<32x128xf32>
    %50 = arith.cmpf ogt, %48, %49 : vector<32x128xf32>
    %cst_35 = arith.constant 0.00999999977 : f32
    %51 = vector.broadcast %cst_35 : f32 to vector<32x128xf32>
    %52 = arith.mulf %51, %48 : vector<32x128xf32>
    %53 = arith.select %50, %48, %52 : vector<32x128xi1>, vector<32x128xf32>
    %c0_36 = arith.constant 0 : index
    %c0_37 = arith.constant 0 : index
    %54 = vector.load %arg10[%c0_36, %c0_37] : memref<1x128xbf16, #tpu.memory_space<vmem>>, vector<1x128xbf16>
    %55 = arith.extf %54 : vector<1x128xbf16> to vector<1x128xf32>
    %56 = vector.broadcast %55 : vector<1x128xf32> to vector<32x128xf32>
    %57 = arith.mulf %53, %56 : vector<32x128xf32>
    %cst_38 = arith.constant dense<0.000000e+00> : vector<32xf32>
    %58 = vector.multi_reduction <add>, %57, %cst_38 [1] : vector<32x128xf32> to vector<32xf32>
    %59 = vector.shape_cast %58 : vector<32xf32> to vector<32x1xf32>
    %c0_39 = arith.constant 0 : index
    %c0_40 = arith.constant 0 : index
    %60 = vector.load %arg11[%c0_39, %c0_40] : memref<1x1xf32, #tpu.memory_space<vmem>>, vector<1x1xf32>
    %61 = vector.broadcast %60 : vector<1x1xf32> to vector<32x1xf32>
    %62 = arith.addf %59, %61 : vector<32x1xf32>
    %c0_41 = arith.constant 0 : index
    %c0_42 = arith.constant 0 : index
    %63 = vector.load %arg12[%c0_41, %c0_42] : memref<32x1xf32, #tpu.memory_space<vmem>>, vector<32x1xf32>
    tpu.vector_store %arg12[%c0_41, %c0_42], %62 {strides = array<i32>} : memref<32x1xf32, #tpu.memory_space<vmem>>, vector<32x1xf32>,
    return
  }
  func.func @transform_0(%arg0: i32) -> (i32, i32, i32) {
    %c0_i32 = arith.constant 0 : i32
    %c0_i32_0 = arith.constant 0 : i32
    %c0_i32_1 = arith.constant 0 : i32
    return %c0_i32, %arg0, %c0_i32_0 : i32, i32, i32
  }
  func.func @transform_1(%arg0: i32) -> (i32, i32, i32) {
    %c0_i32 = arith.constant 0 : i32
    %c0_i32_0 = arith.constant 0 : i32
    %c0_i32_1 = arith.constant 0 : i32
    %c0_i32_2 = arith.constant 0 : i32
    return %c0_i32, %c0_i32_0, %c0_i32_1 : i32, i32, i32
  }
  func.func @transform_2(%arg0: i32) -> (i32, i32) {
    %c0_i32 = arith.constant 0 : i32
    %c0_i32_0 = arith.constant 0 : i32
    %c0_i32_1 = arith.constant 0 : i32
    return %c0_i32, %c0_i32_0 : i32, i32
  }
  func.func @transform_3(%arg0: i32) -> (i32, i32) {
    %c0_i32 = arith.constant 0 : i32
    %c0_i32_0 = arith.constant 0 : i32
    %c0_i32_1 = arith.constant 0 : i32
    return %c0_i32, %c0_i32_0 : i32, i32
  }
  func.func @transform_4(%arg0: i32) -> (i32, i32) {
    %c0_i32 = arith.constant 0 : i32
    %c0_i32_0 = arith.constant 0 : i32
    %c0_i32_1 = arith.constant 0 : i32
    return %c0_i32, %c0_i32_0 : i32, i32
  }
  func.func @transform_5(%arg0: i32) -> (i32, i32) {
    %c0_i32 = arith.constant 0 : i32
    %c0_i32_0 = arith.constant 0 : i32
    %c0_i32_1 = arith.constant 0 : i32
    return %c0_i32, %c0_i32_0 : i32, i32
  }
  func.func @transform_6(%arg0: i32) -> (i32, i32) {
    %c0_i32 = arith.constant 0 : i32
    %c0_i32_0 = arith.constant 0 : i32
    %c0_i32_1 = arith.constant 0 : i32
    return %c0_i32, %c0_i32_0 : i32, i32
  }
  func.func @transform_7(%arg0: i32) -> (i32, i32) {
    %c0_i32 = arith.constant 0 : i32
    %c0_i32_0 = arith.constant 0 : i32
    %c0_i32_1 = arith.constant 0 : i32
    return %c0_i32, %c0_i32_0 : i32, i32
  }
  func.func @transform_8(%arg0: i32) -> (i32, i32) {
    %c0_i32 = arith.constant 0 : i32
    %c0_i32_0 = arith.constant 0 : i32
    %c0_i32_1 = arith.constant 0 : i32
    return %c0_i32, %c0_i32_0 : i32, i32
  }
  func.func @transform_9(%arg0: i32) -> (i32, i32) {
    %c0_i32 = arith.constant 0 : i32
    %c0_i32_0 = arith.constant 0 : i32
    %c0_i32_1 = arith.constant 0 : i32
    return %c0_i32, %c0_i32_0 : i32, i32
  }
  func.func @transform_10(%arg0: i32) -> (i32, i32) {
    %c0_i32 = arith.constant 0 : i32
    %c0_i32_0 = arith.constant 0 : i32
    %c0_i32_1 = arith.constant 0 : i32
    return %c0_i32, %c0_i32_0 : i32, i32
  }
  func.func @transform_11(%arg0: i32) -> (i32, i32) {
    %c0_i32 = arith.constant 0 : i32
    %c0_i32_0 = arith.constant 0 : i32
    return %arg0, %c0_i32 : i32, i32
  }
}

</mosaic_0001>

<bundles_post_ra>
// kernel: tpu_custom_call.1
= control target key start
LH: loop header
LB: loop body
LE: loop exit
PB: predicated region body
PF: predicated region fallthrough
CT: control target
= control target key end

     0   :  { %s2493_s0 = inlined_call_operand.hbm [shape: f32[2,64,4], index: 0, kind: input, shape index: {}]   ;;  %s2494_s1 = inlined_call_operand.hbm [shape: bf16[2,4,128], index: 1, kind: input, shape index: {}]   ;;  %s2495_s2 = inlined_call_operand.hbm [shape: f32[1,128], index: 2, kind: input, shape index: {}]   ;;  %s2496_s3 = inlined_call_operand.hbm [shape: bf16[128,128], index: 3, kind: input, shape index: {}]   ;;  %s2497_s4 = inlined_call_operand.hbm [shape: f32[1,128], index: 4, kind: input, shape index: {}]   ;;  %s2498_s5 = inlined_call_operand.hbm [shape: bf16[128,128], index: 5, kind: input, shape index: {}]   ;;  %s2499_s6 = inlined_call_operand.hbm [shape: f32[1,128], index: 6, kind: input, shape index: {}]   ;;  %s2500_s7 = inlined_call_operand.hbm [shape: bf16[128,128], index: 7, kind: input, shape index: {}]   ;;  %s2501_s8 = inlined_call_operand.hbm [shape: f32[1,128], index: 8, kind: input, shape index: {}]   ;;  %s2502_s9 = inlined_call_operand.hbm [shape: bf16[1,128], index: 9, kind: input, shape index: {}]   ;;  %s2503_s10 = inlined_call_operand.<no memory space> [shape: f32[1,1], index: 10, kind: input, shape index: {}]   ;;  %s2504_s11 = inlined_call_operand.hbm [shape: f32[64,1], index: 11, kind: output, shape index: {}]  }
   0x1   :  { %2522 = sst [smem:[#allocation39_spill]] %s2494_s1  ;;  %v16_v0 = vstv %s2503_s10 }
   0x2   :  { %2523 = sst [smem:[#allocation40_spill]] %s2504_s11  ;;  %17 = vst [vmem:[#allocation2] sm:$0x1] %v16_v0 }
   0x3   :  { %18 = vsyncpa [#allocation4], 0 }
   0x4   :  { %20 = vsyncpa [#allocation4 + $0x1], 0 }
   0x5   :  { %21 = vsyncpa [#allocation7], 0 }
   0x6   :  { %22 = vsyncpa [#allocation10], 0 }
   0x7   :  { %23 = vsyncpa [#allocation13], 0 }
   0x8   :  { %24 = vsyncpa [#allocation16], 0 }
   0x9   :  { %25 = vsyncpa [#allocation19], 0 }
   0xa   :  { %26 = vsyncpa [#allocation5], 0 }
   0xb   :  { %28 = vsyncpa [#allocation5 + $0x1], 0  ;;  %s2109_s19 = smov 0   ;;  %s2111_s20 = smov 0  }
   0xc   :  { %s2113_s21 = smov 0   ;;  %s2115_s22 = smov 0  }
   0xd LB: > { %2524 = sst [smem:[#allocation31_spill]] %s2010_s19  ;;  %s2130_s10 = sadd.s32 4294967295, %s2022_s22   ;;  %s2022_s22 = sphi %s2115_s22, %s2562_s22   ;;  %s2018_s21 = sphi %s2113_s21, %s2566_s21   ;;  %s2014_s20 = sphi %s2111_s20, %s2565_s20   ;;  %s2010_s19 = sphi %s2109_s19, %s2563_s19  }
   0xe   : > { %2525 = sst [smem:[#allocation32_spill]] %s2014_s20  ;;  %s1322_s23 = sadd.s32 4294967294, %s2022_s22  }
   0xf   : > { %2526 = sst [smem:[#allocation33_spill]] %s2130_s10  ;;  %s2134_s24 = sadd.s32 1, %s2022_s22  }
  0x10   : > { %2527 = sst [smem:[#allocation34_spill]] %s2134_s24  ;;  %s41_s25 = sadd.s32 1, %s2018_s21 }
  0x11   : > { %s38_s26 = ssub.s32 %s2022_s22, %s2134_s24  ;;  %p48_p0 = scmp.ne.s32.totalorder %s2018_s21, %s2014_s20 }
  0x12   : > { %p39_p1 = scmp.eq.s32.totalorder %s38_s26, 0  ;;  %p49_p2 = scmp.eq.s32.totalorder %s2022_s22, 0 }
  0x13   : > { %p54_p3 = scmp.ne.s32.totalorder %s2014_s20, %s2010_s19  ;;  %p2508_p4 = scmp.eq.s32.totalorder %s2130_s10, 0 }
  0x14   : > { %s2146_s27 = scalar_select %p39_p1, %s2018_s21, %s41_s25  }
  0x15   : > { %p2148_p5 = por %p49_p2, %p48_p0  ;;  %p2154_p6 = por %p2508_p4, %p54_p3 }
  0x16   : > { %2528 = sst [smem:[#allocation35_spill]] %s2146_s27  ;;  %p288_p7 = scmp.eq.s32.totalorder %s2130_s10, 1 }
  0x17   : > { %s2529_s28 = scalar_select %p2148_p5, 1, 0 }
  0x18   : > { %s2530_s29 = scalar_select %p2154_p6, 1, 0 }
  0x19   : > { %p294_p8 = scmp.eq.s32.totalorder %s1322_s23, 1  ;;  %p1323_p9 = scmp.ge.s32.totalorder %s2022_s22, 1 }
  0x1a   : > { %2531 = sst [smem:[#allocation36_spill]] %s2530_s29  ;;  %p301_p10 = scmp.lt.s32.totalorder %s2022_s22, 3 }
  0x1b   : > { %p2161_p11 = por %p288_p7, %p48_p0  ;;  %p2165_p12 = por %p294_p8, %p54_p3 }
  0x1c   : > { %p2169_p13 = pnand %p1323_p9, %p301_p10  ;;  %s2024_s14 = smov [#allocation6]  }
  0x1d   : > { %s2532_s30 = scalar_select %p2161_p11, 1, 0 }
  0x1e   : > { %s2534_s12 = scalar_select %p2165_p12, 1, 0 }
  0x1f   : > { %2533 = sst [smem:[#allocation37_spill]] %s2532_s30  ;;  %p1556_p1 = pneg %p2169_p13 }
  0x20   : > { %2535 = sst [smem:[#allocation38_spill]] %s2534_s12  ;;  %s313_s15 = sshll.u32 %s2024_s14, 4  ;;  %s314_s15 = int_to_ptr.vmem [resolvable:$true] %s313_s15 }
  0x21   : > { %s2536_s13 = scalar_select %p2169_p13, 1, 0 }
  0x22   : > { %p2177_p2 = pnand %p1556_p1, %p2508_p4  ;;  %s2025_s17 = smov [#allocation9]  }
  0x23   : > { %s337_s18 = sshll.u32 %s2025_s17, 4  ;;  %s2538_s1 = sld [smem:[#allocation39_spill]]  ;;  %s2181_s18 = int_to_ptr.vmem [resolvable:$true] %s337_s18 }
  0x24   : > { %p2191_p3 = pneg %p2177_p2 }
  0x29   : > { %s1684_s26 = scalar_lea.hbm %s2538_s1, 64 }
  0x2a   : > { %p1685_p0 = scmp.ne.s32.totalorder %s2538_s1, %s1684_s26  ;;  %p1691_p9 = scmp.lt.u32.totalorder %s1684_s26, %s2538_s1 }
  0x2c   : > { %p1687_p7 = pnand %p2191_p3, %p1685_p0 }
  0x2e   : > { %p1688_p8 = pneg %p1687_p7 }
  0x30   : > { %p1693_p10 = pnand %p1691_p9, %p1688_p8 }
  0x32   : > { %1696 = shalt.err (!%p1693_p10)
}
  0x33   : > { %s1697_s23 = scalar_lea.vmem %s314_s15, 64  ;;  %p1705_p11 = scmp.lt.s32.totalorder %s314_s15, %s314_s15 }
  0x34   : > { %p1698_p1 = scmp.ne.s32.totalorder %s314_s15, %s1697_s23  ;;  %p1706_p6 = scmp.lt.s32.totalorder %s1697_s23, %s1697_s23 }
  0x36   : > { %p1700_p4 = pnand %p1698_p1, %p2191_p3  ;;  %p1707_p13 = por %p1706_p6, %p1705_p11 }
  0x38   : > { %p1701_p12 = pneg %p1700_p4 }
  0x3a   : > { %p1708_p5 = pnand %p1707_p13, %p1701_p12 }
  0x3c   : > { %1711 = shalt.err (!%p1708_p5)
}
  0x3d   : > { %s2026_s24 = smov 32   ;;  %s2027_s27 = smov 2  }
  0x3e   : > { %1559 = dma.hbm_to_vmem [thread:$0]  (!%p2177_p2), %s2538_s1, 64, %s314_s15, [#allocation7], %s2026_s24, %s2026_s24, %s2027_s27  }
  0x3f   : > { %s1712_s19 = scalar_lea.hbm %s2496_s3, 1024 }
  0x40   : > { %p1713_p4 = scmp.ne.s32.totalorder %s2496_s3, %s1712_s19  ;;  %p1719_p11 = scmp.lt.u32.totalorder %s1712_s19, %s2496_s3 }
  0x42   : > { %p1715_p6 = pnand %p1713_p4, %p2191_p3 }
  0x44   : > { %p1716_p5 = pneg %p1715_p6 }
  0x46   : > { %p1721_p12 = pnand %p1719_p11, %p1716_p5 }
  0x48   : > { %1724 = shalt.err (!%p1721_p12)
}
  0x49   : > { %s1725_s15 = scalar_lea.vmem %s2181_s18, 1024  ;;  %p1733_p8 = scmp.lt.s32.totalorder %s2181_s18, %s2181_s18 }
  0x4a   : > { %p1726_p13 = scmp.ne.s32.totalorder %s2181_s18, %s1725_s15  ;;  %p1734_p9 = scmp.lt.s32.totalorder %s1725_s15, %s1725_s15 }
  0x4c   : > { %p1728_p0 = pnand %p1726_p13, %p2191_p3  ;;  %p1735_p10 = por %p1734_p9, %p1733_p8 }
  0x4e   : > { %p1729_p7 = pneg %p1728_p0 }
  0x50   : > { %p1736_p1 = pnand %p1735_p10, %p1729_p7 }
  0x52   : > { %1739 = shalt.err (!%p1736_p1)
}
  0x53   : > { %s2028_s11 = smov 64   ;;  %s2029_s19 = smov 4  }
  0x54   : > { %1565 = dma.hbm_to_vmem [thread:$0]  (!%p2177_p2), %s2496_s3, 1024, %s2181_s18, [#allocation10], %s2028_s11, %s2028_s11, %s2029_s19  }
  0x55   : > { %s2030_s24 = smov [#allocation12]   ;;  %s2031_s12 = smov [#allocation15]  }
  0x56   : > { %s361_s27 = sshll.u32 %s2030_s24, 4  ;;  %s385_s25 = sshll.u32 %s2031_s12, 4  ;;  %s362_s27 = int_to_ptr.vmem [resolvable:$true] %s361_s27  ;;  %s386_s25 = int_to_ptr.vmem [resolvable:$true] %s385_s25 }
  0x57   : > { %s1740_s23 = scalar_lea.hbm %s2498_s5, 1024 }
  0x58   : > { %p1741_p4 = scmp.ne.s32.totalorder %s2498_s5, %s1740_s23  ;;  %p1747_p11 = scmp.lt.u32.totalorder %s1740_s23, %s2498_s5 }
  0x5a   : > { %p1743_p6 = pnand %p1741_p4, %p2191_p3 }
  0x5c   : > { %p1744_p5 = pneg %p1743_p6 }
  0x5e   : > { %p1749_p12 = pnand %p1747_p11, %p1744_p5 }
  0x60   : > { %1752 = shalt.err (!%p1749_p12)
}
  0x61   : > { %s1753_s18 = scalar_lea.vmem %s362_s27, 1024  ;;  %p1761_p8 = scmp.lt.s32.totalorder %s362_s27, %s362_s27 }
  0x62   : > { %p1754_p13 = scmp.ne.s32.totalorder %s362_s27, %s1753_s18  ;;  %p1762_p9 = scmp.lt.s32.totalorder %s1753_s18, %s1753_s18 }
  0x64   : > { %p1756_p0 = pnand %p1754_p13, %p2191_p3  ;;  %p1763_p10 = por %p1762_p9, %p1761_p8 }
  0x66   : > { %p1757_p7 = pneg %p1756_p0 }
  0x68   : > { %p1764_p1 = pnand %p1763_p10, %p1757_p7 }
  0x6a   : > { %1767 = shalt.err (!%p1764_p1)
}
  0x6b   : > { %1571 = dma.hbm_to_vmem [thread:$0]  (!%p2177_p2), %s2498_s5, 1024, %s362_s27, [#allocation13], %s2028_s11, %s2028_s11, %s2029_s19  }
  0x6c   : > { %s1768_s30 = scalar_lea.hbm %s2500_s7, 1024 }
  0x6d   : > { %p1769_p4 = scmp.ne.s32.totalorder %s2500_s7, %s1768_s30  ;;  %p1775_p11 = scmp.lt.u32.totalorder %s1768_s30, %s2500_s7 }
  0x6f   : > { %p1771_p6 = pnand %p1769_p4, %p2191_p3 }
  0x71   : > { %p1772_p5 = pneg %p1771_p6 }
  0x73   : > { %p1777_p12 = pnand %p1775_p11, %p1772_p5 }
  0x75   : > { %1780 = shalt.err (!%p1777_p12)
}
  0x76   : > { %s1781_s23 = scalar_lea.vmem %s386_s25, 1024  ;;  %p1789_p8 = scmp.lt.s32.totalorder %s386_s25, %s386_s25 }
  0x77   : > { %p1782_p13 = scmp.ne.s32.totalorder %s386_s25, %s1781_s23  ;;  %p1790_p9 = scmp.lt.s32.totalorder %s1781_s23, %s1781_s23 }
  0x79   : > { %p1784_p0 = pnand %p1782_p13, %p2191_p3  ;;  %p1791_p10 = por %p1790_p9, %p1789_p8 }
  0x7b   : > { %p1785_p7 = pneg %p1784_p0 }
  0x7d   : > { %p1792_p1 = pnand %p1791_p10, %p1785_p7 }
  0x7f   : > { %1795 = shalt.err (!%p1792_p1)
}
  0x80   : > { %1577 = dma.hbm_to_vmem [thread:$0]  (!%p2177_p2), %s2500_s7, 1024, %s386_s25, [#allocation16], %s2028_s11, %s2028_s11, %s2029_s19  }
  0x81   : > { %s2032_s18 = smov [#allocation8]   ;;  %s2033_s20 = smov [#allocation11]  }
  0x82   : > { %s327_s1 = sshll.u32 %s2032_s18, 4  ;;  %s351_s29 = sshll.u32 %s2033_s20, 4  ;;  %s328_s1 = int_to_ptr.vmem [resolvable:$true] %s327_s1  ;;  %s352_s29 = int_to_ptr.vmem [resolvable:$true] %s351_s29 }
  0x83   : > { %s1796_s24 = scalar_lea.hbm %s2495_s2, 16 }
  0x84   : > { %p1797_p4 = scmp.ne.s32.totalorder %s2495_s2, %s1796_s24  ;;  %p1803_p11 = scmp.lt.u32.totalorder %s1796_s24, %s2495_s2 }
  0x86   : > { %p1799_p6 = pnand %p1797_p4, %p2191_p3 }
  0x88   : > { %p1800_p5 = pneg %p1799_p6 }
  0x8a   : > { %p1805_p12 = pnand %p1803_p11, %p1800_p5 }
  0x8c   : > { %1808 = shalt.err (!%p1805_p12)
}
  0x8d   : > { %s1809_s11 = scalar_lea.vmem %s328_s1, 16  ;;  %s1816_s19 = scalar_lea.vmem %s328_s1, 32 }
  0x8e   : > { %p1810_p13 = scmp.ne.s32.totalorder %s328_s1, %s1809_s11  ;;  %p1817_p8 = scmp.lt.s32.totalorder %s328_s1, %s328_s1 }
  0x8f   : > { %p1818_p9 = scmp.lt.s32.totalorder %s1816_s19, %s1809_s11 }
  0x90   : > { %p1812_p0 = pnand %p1810_p13, %p2191_p3 }
  0x91   : > { %p1819_p10 = por %p1818_p9, %p1817_p8 }
  0x92   : > { %p1813_p7 = pneg %p1812_p0 }
  0x94   : > { %p1820_p1 = pnand %p1819_p10, %p1813_p7 }
  0x96   : > { %1823 = shalt.err (!%p1820_p1)
}
  0x97   : > { %1562 = dma.hbm_to_vmem [thread:$0]  (!%p2177_p2), %s2495_s2, 16, %s328_s1, [#allocation7]  }
  0x98   : > { %s1824_s20 = scalar_lea.hbm %s2497_s4, 16 }
  0x99   : > { %p1825_p4 = scmp.ne.s32.totalorder %s2497_s4, %s1824_s20  ;;  %p1831_p11 = scmp.lt.u32.totalorder %s1824_s20, %s2497_s4 }
  0x9b   : > { %p1827_p6 = pnand %p1825_p4, %p2191_p3 }
  0x9d   : > { %p1828_p5 = pneg %p1827_p6 }
  0x9f   : > { %p1833_p12 = pnand %p1831_p11, %p1828_p5 }
  0xa1   : > { %1836 = shalt.err (!%p1833_p12)
}
  0xa2   : > { %s1837_s26 = scalar_lea.vmem %s352_s29, 16  ;;  %s1844_s1 = scalar_lea.vmem %s352_s29, 32 }
  0xa3   : > { %p1838_p13 = scmp.ne.s32.totalorder %s352_s29, %s1837_s26  ;;  %p1845_p8 = scmp.lt.s32.totalorder %s352_s29, %s352_s29 }
  0xa4   : > { %p1846_p9 = scmp.lt.s32.totalorder %s1844_s1, %s1837_s26 }
  0xa5   : > { %p1840_p0 = pnand %p1838_p13, %p2191_p3 }
  0xa6   : > { %p1847_p10 = por %p1846_p9, %p1845_p8 }
  0xa7   : > { %p1841_p7 = pneg %p1840_p0 }
  0xa9   : > { %p1848_p1 = pnand %p1847_p10, %p1841_p7 }
  0xab   : > { %1851 = shalt.err (!%p1848_p1)
}
  0xac   : > { %1568 = dma.hbm_to_vmem [thread:$0]  (!%p2177_p2), %s2497_s4, 16, %s352_s29, [#allocation10]  }
  0xad   : > { %s2034_s11 = smov [#allocation14]   ;;  %s2035_s25 = smov [#allocation17]  }
  0xae   : > { %s375_s19 = sshll.u32 %s2034_s11, 4  ;;  %s399_s27 = sshll.u32 %s2035_s25, 4  ;;  %s376_s19 = int_to_ptr.vmem [resolvable:$true] %s375_s19  ;;  %s400_s27 = int_to_ptr.vmem [resolvable:$true] %s399_s27 }
  0xaf   : > { %s1852_s20 = scalar_lea.hbm %s2499_s6, 16 }
  0xb0   : > { %p1853_p4 = scmp.ne.s32.totalorder %s2499_s6, %s1852_s20  ;;  %p1859_p11 = scmp.lt.u32.totalorder %s1852_s20, %s2499_s6 }
  0xb2   : > { %p1855_p6 = pnand %p1853_p4, %p2191_p3 }
  0xb4   : > { %p1856_p5 = pneg %p1855_p6 }
  0xb6   : > { %p1861_p12 = pnand %p1859_p11, %p1856_p5 }
  0xb8   : > { %1864 = shalt.err (!%p1861_p12)
}
  0xb9   : > { %s1865_s29 = scalar_lea.vmem %s376_s19, 16  ;;  %s1872_s26 = scalar_lea.vmem %s376_s19, 32 }
  0xba   : > { %p1866_p13 = scmp.ne.s32.totalorder %s376_s19, %s1865_s29  ;;  %p1873_p8 = scmp.lt.s32.totalorder %s376_s19, %s376_s19 }
  0xbb   : > { %p1874_p9 = scmp.lt.s32.totalorder %s1872_s26, %s1865_s29 }
  0xbc   : > { %p1868_p0 = pnand %p1866_p13, %p2191_p3 }
  0xbd   : > { %p1875_p10 = por %p1874_p9, %p1873_p8 }
  0xbe   : > { %p1869_p7 = pneg %p1868_p0 }
  0xc0   : > { %p1876_p1 = pnand %p1875_p10, %p1869_p7 }
  0xc2   : > { %1879 = shalt.err (!%p1876_p1)
}
  0xc3   : > { %1574 = dma.hbm_to_vmem [thread:$0]  (!%p2177_p2), %s2499_s6, 16, %s376_s19, [#allocation13]  }
  0xc4   : > { %s1880_s25 = scalar_lea.hbm %s2501_s8, 16 }
  0xc5   : > { %p1881_p4 = scmp.ne.s32.totalorder %s2501_s8, %s1880_s25  ;;  %p1887_p11 = scmp.lt.u32.totalorder %s1880_s25, %s2501_s8 }
  0xc7   : > { %p1883_p6 = pnand %p1881_p4, %p2191_p3 }
  0xc9   : > { %p1884_p5 = pneg %p1883_p6 }
  0xcb   : > { %p1889_p12 = pnand %p1887_p11, %p1884_p5 }
  0xcd   : > { %1892 = shalt.err (!%p1889_p12)
}
  0xce   : > { %s1893_s30 = scalar_lea.vmem %s400_s27, 16  ;;  %s1900_s19 = scalar_lea.vmem %s400_s27, 32 }
  0xcf   : > { %p1894_p13 = scmp.ne.s32.totalorder %s400_s27, %s1893_s30  ;;  %p1901_p8 = scmp.lt.s32.totalorder %s400_s27, %s400_s27 }
  0xd0   : > { %p1902_p9 = scmp.lt.s32.totalorder %s1900_s19, %s1893_s30 }
  0xd1   : > { %p1896_p0 = pnand %p1894_p13, %p2191_p3 }
  0xd2   : > { %p1903_p10 = por %p1902_p9, %p1901_p8 }
  0xd3   : > { %p1897_p7 = pneg %p1896_p0 }
  0xd5   : > { %p1904_p1 = pnand %p1903_p10, %p1897_p7 }
  0xd7   : > { %1907 = shalt.err (!%p1904_p1)
}
  0xd8   : > { %1580 = dma.hbm_to_vmem [thread:$0]  (!%p2177_p2), %s2501_s8, 16, %s400_s27, [#allocation16]  }
  0xd9   : > { %s2036_s29 = smov [#allocation18]   ;;  %s1908_s23 = scalar_lea.hbm %s2502_s9, 16 }
  0xda   : > { %s410_s26 = sshll.u32 %s2036_s29, 4  ;;  %p1909_p4 = scmp.ne.s32.totalorder %s2502_s9, %s1908_s23  ;;  %s411_s26 = int_to_ptr.vmem [resolvable:$true] %s410_s26 }
  0xdb   : > { %p1915_p11 = scmp.lt.u32.totalorder %s1908_s23, %s2502_s9 }
  0xdc   : > { %p1911_p6 = pnand %p1909_p4, %p2191_p3 }
  0xde   : > { %p1912_p5 = pneg %p1911_p6 }
  0xe0   : > { %p1917_p12 = pnand %p1915_p11, %p1912_p5 }
  0xe2   : > { %1920 = shalt.err (!%p1917_p12)
}
  0xe3   : > { %s1921_s27 = scalar_lea.vmem %s411_s26, 16  ;;  %s1928_s20 = scalar_lea.vmem %s411_s26, 32 }
  0xe4   : > { %p1922_p13 = scmp.ne.s32.totalorder %s411_s26, %s1921_s27  ;;  %p1929_p8 = scmp.lt.s32.totalorder %s411_s26, %s411_s26 }
  0xe5   : > { %p1930_p9 = scmp.lt.s32.totalorder %s1928_s20, %s1921_s27 }
  0xe6   : > { %p1924_p0 = pnand %p1922_p13, %p2191_p3 }
  0xe7   : > { %p1931_p10 = por %p1930_p9, %p1929_p8 }
  0xe8   : > { %p1925_p7 = pneg %p1924_p0 }
  0xea   : > { %p1932_p1 = pnand %p1931_p10, %p1925_p7 }
  0xec   : > { %1935 = shalt.err (!%p1932_p1)
}
  0xed   : > { %1583 = dma.hbm_to_vmem [thread:$0]  (!%p2177_p2), %s2502_s9, 16, %s411_s26, [#allocation19]  }
  0xee   : > { %p1333_p4 = scmp.ge.s32.totalorder %s2022_s22, 2 }
  0xf0   : > { %420 = sbr.rel (%p1333_p4) target bundleno = 262 (0x106), region = 56 }
  0xf7   : > { %s424_s14 = sand.u32 1, %s2018_s21   ;;  %s1393_s19 = sshll.u32 %s2022_s22, 9 }
  0xf8   : > { %s1334_s16 = sshll.u32 %s424_s14, 6  ;;  %s434_s29 = scalar_lea.hbm %s2493_s0, %s1393_s19 }
  0xf9   : > { %p2540_p2 = scmp.ne.s32.totalorder %s2529_s28, 0  ;;  %s428_s1 = scalar_lea.vmem [#allocation3], %s1334_s16 }
  0xfa   : > { %s447_s17 = sshll.u32 %s428_s1, 4  ;;  %s2037_s11 = smov 1024   ;;  %s448_s17 = int_to_ptr.vmem [resolvable:$true] %s447_s17 }
  0xfb   : > { %s1527_s26 = scalar_select %p2540_p2, [#allocation0], [#allocation23] }
  0xfc   : > { %1528 = sst [smem:[#allocation22]] (%p2540_p2), %s2037_s11  ;;  %s2038_s25 = smov 512  }
  0xfd   : > { %s439_s23 = sld [smem:[%s1527_s26]]   ;;  %s2039_s15 = smov 4  }
  0xfe   : > { %1529 = sst [smem:[#allocation22 + $0x1]] (%p2540_p2), %s2038_s25  ;;  %s2040_s18 = smov 128  }
  0xff   : > { %1530 = sst [smem:[#allocation22 + $0x2]] (%p2540_p2), %s2039_s15  ;;  %s2041_s20 = smov 8  }
 0x100   : > { %1531 = sst [smem:[#allocation22 + $0x3]] (%p2540_p2), %s2040_s18  ;;  %s425_s30 = scalar_lea.sflag [#allocation4], %s424_s14 }
 0x101   : > { %1532 = sst [smem:[#allocation22 + $0x4]] (%p2540_p2), %s2040_s18  ;;  %s2042_s19 = smov [#allocation21]  }
 0x102   : > { %1533 = sst [smem:[#allocation22 + $0x5]] (%p2540_p2), %s2041_s20 }
 0x103   : > { %s1337_s27 = sshll.u32 %s439_s23, 26 }
 0x104   : > { %s1338_s10 = sadd.s32 134217728, %s1337_s27 }
 0x105   : > { %1534 = dma.general (%p2540_p2), %s434_s29, 1024, %s448_s17, %s425_s30, %s2042_s19, [#allocation22], %s1338_s10, 0  }
 0x106 PF: > { %p2541_p3 = scmp.ne.s32.totalorder %s2536_s13, 0 }
 0x107   : > { %s2542_s16 = sld [smem:[#allocation32_spill]] (!%p2541_p3)  ;;  %s2543_s24 = sld [smem:[#allocation36_spill]] (!%p2541_p3) }
 0x108   : > { %472 = sbr.rel (%p2541_p3) target bundleno = 1363 (0x553), region = 64 }
 0x10d   : > { %s2392_s12 = sand.u32 (!%p2541_p3), 1, %s2542_s16   ;;  %p2544_p6 = scmp.ne.s32.totalorder (!%p2541_p3), %s2543_s24, 0 }
 0x10e   : > { %s1340_s26 = sshll.u32 (!%p2541_p3), %s2392_s12, 6  ;;  %s475_s1 = scalar_lea.sflag (!%p2541_p3), [#allocation4], %s2392_s12 }
 0x10f   : > { %s2396_s23 = scalar_lea.vmem [#allocation3], %s1340_s26 }
 0x110   : > { %1981 = dma.done.wait (%p2544_p6), %s475_s1, 1024  }
 0x111   : > { %1983 = vsyncadd (%p2544_p6), %s475_s1, 4294966272  ;;  %s2545_s28 = sld [smem:[#allocation33_spill]] }
 0x117   : > { %p2546_p5 = scmp.eq.s32.totalorder %s2545_s28, 0 }
 0x119   : > { %1985 = dma.done.wait (%p2546_p5), [#allocation7], 80   ;;  %p2547_p11 = pmov %p2546_p5 }
 0x11a   : > { %p2548_p12 = pmov %p2546_p5 }
 0x11b   : > { %1987 = vsyncadd (%p2547_p11), [#allocation7], 4294967216 }
 0x11c   : > { %1989 = dma.done.wait (%p2548_p12), [#allocation10], 1040   ;;  %p2549_p13 = pmov %p2546_p5 }
 0x11d   : > { %p2550_p0 = pmov %p2546_p5 }
 0x11e   : > { %1991 = vsyncadd (%p2549_p13), [#allocation10], 4294966256 }
 0x11f   : > { %1993 = dma.done.wait (%p2550_p0), [#allocation13], 1040   ;;  %p2551_p7 = pmov %p2550_p0 }
 0x120   : > { %p2552_p8 = pmov %p2550_p0 }
 0x121   : > { %1995 = vsyncadd (%p2551_p7), [#allocation13], 4294966256 }
 0x122   : > { %1997 = dma.done.wait (%p2552_p8), [#allocation16], 1040   ;;  %p2553_p9 = pmov %p2550_p0 }
 0x123   : > { %p2554_p10 = pmov %p2550_p0 }
 0x124   : > { %1999 = vsyncadd (%p2553_p9), [#allocation16], 4294966256 }
 0x125   : > { %2001 = dma.done.wait (%p2554_p10), [#allocation19], 16   ;;  %p2555_p1 = pmov %p2550_p0 }
 0x126   : > { %vm579_vm0 = vcmask 1041408   ;;  %v571_v1 = vld [vmem:[#allocation6 + $0x2] sm:$0x3]  ;;  %v1352_v3 = vld [vmem:[%s2396_s23 + $0x28] sm:$0xff]  ;;  %vm572_vm1 = vcmask 31744   ;;  %v1353_v6 = vld [vmem:[%s2396_s23 + $0x30] sm:$0xff] }
 0x127   : > { %2003 = vsyncadd (%p2555_p1), [#allocation19], 4294967280  ;;  %v1351_v2 = vld [vmem:[%s2396_s23 + $0x20] sm:$0xff]  ;;  %1507 = vmatprep.subr.msk.bf16.mxu0 %vm579_vm0, %v571_v1  ;;  %v581_v4 = vsel %vm579_vm0, %v571_v1, 0  ;;  %v1354_v7 = vld [vmem:[%s2396_s23 + $0x38] sm:$0xff]  ;;  %s1350_s13 = sshll.u32 %s2392_s12, 5 }
 0x128   : > { %v567_v5 = vpack.c.bf16 %v1352_v3, %v1351_v2  ;;  %v569_v8 = vld [vmem:[#allocation6] sm:$0x3]  ;;  %1432 = vmatpush3.bf16.msra.mxu0 %v581_v4  ;;  %v568_v9 = vpack.c.bf16 %v1354_v7, %v1353_v6  ;;  %v557_v11 = vld [vmem:[%s2396_s23 + $0x8] sm:$0xff]  ;;  %v558_v16 = vld [vmem:[%s2396_s23 + $0x10] sm:$0xff]  ;;  %s552_s14 = scalar_lea.vmem [#allocation20], %s1350_s13  ;;  %s2556_s17 = sld [smem:[#allocation37_spill]] }
 0x129   : > { %v556_v10 = vld [vmem:[%s2396_s23] sm:$0xff]  ;;  %1508 = vmatprep.subr.msk.bf16.mxu0 %vm579_vm0, %v569_v8  ;;  %v639_v12 = vsel %vm579_vm0, %v569_v8, 0  ;;  %v1661_v15 = vld [vmem:[#allocation9 + $0x8] sm:$0xff]   ;;  %v559_v17 = vld [vmem:[%s2396_s23 + $0x18] sm:$0xff]  ;;  %s1163_s29 = sshll.u32 %s552_s14, 4  ;;  %s1394_s11 = sshll.u32 %s2545_s28, 9  ;;  %s2441_s29 = int_to_ptr.vmem [resolvable:$true] %s1163_s29 }
 0x12a   : > { %1433 = vmatprep.mubr.msk.bf16.mxu0 %vm572_vm1, %v567_v5  ;;  %v560_v13 = vpack.c.bf16 %v557_v11, %v556_v10  ;;  %v1660_v14 = vld [vmem:[#allocation9] sm:$0xff]   ;;  %v1662_v18 = vld [vmem:[#allocation9 + $0x10] sm:$0xff]   ;;  %v1663_v19 = vld [vmem:[#allocation9 + $0x18] sm:$0xff]   ;;  %v561_v20 = vpack.c.bf16 %v559_v17, %v558_v16  ;;  %s2557_s18 = sld [smem:[#allocation40_spill]]  ;;  %s1150_s20 = scalar_lea.sflag [#allocation5], %s2392_s12 }
 0x12b   : > { %1434 = vmatmul.mubr.msk.bf16.vlgmr.msra.gmra.mrb[0].mxu0 %vm572_vm1, %v568_v9  ;;  %1443 = vmatprep.subr.bf16.mxu1 %v1660_v14  ;;  %v1664_v21 = vld [vmem:[#allocation9 + $0x20] sm:$0xff]   ;;  %v1665_v22 = vld [vmem:[#allocation9 + $0x28] sm:$0xff]   ;;  %v1666_v23 = vld [vmem:[#allocation9 + $0x30] sm:$0xff]   ;;  %s1936_s10 = scalar_lea.vmem %s2441_s29, 512  ;;  %s2043_s30 = smov [#allocation20]  }
 0x12c   : > { %1438 = vmatpush3.bf16.msra.mxu0 %v639_v12  ;;  %1439 = vmatprep.mubr.msk.bf16.mxu0 %vm572_vm1, %v560_v13  ;;  %v1667_v24 = vld [vmem:[#allocation9 + $0x38] sm:$0xff]   ;;  %v1668_v25 = vld [vmem:[#allocation12] sm:$0xff]   ;;  %v1669_v26 = vld [vmem:[#allocation12 + $0x8] sm:$0xff]   ;;  %p1937_p2 = scmp.ne.s32.totalorder %s2441_s29, %s1936_s10  ;;  %s1940_s19 = sshll.u32 %s2043_s30, 4  ;;  %s1941_s19 = int_to_ptr.vmem [resolvable:$false] %s1940_s19 }
 0x12d   : > { %1444 = vmatpush3.bf16.msra.mxu1 %v1660_v14  ;;  %1463 = vmatprep.subr.bf16.mxu0 %v1668_v25  ;;  %v1670_v27 = vld [vmem:[#allocation12 + $0x10] sm:$0xff]   ;;  %v1671_v28 = vld [vmem:[#allocation12 + $0x18] sm:$0xff]   ;;  %v1672_v29 = vld [vmem:[#allocation12 + $0x20] sm:$0xff]   ;;  %s1942_s16 = scalar_lea.vmem %s1941_s19, 1024  ;;  %p1943_p11 = scmp.lt.s32.totalorder %s2441_s29, %s1941_s19 }
 0x12e   : > { %1445 = vmatprep.subr.bf16.mxu1 %v1661_v15  ;;  %v1359_v30 = vld [vmem:[#allocation8] ss:$0 sm:$0xff]  ;;  %v1673_v49 = vld [vmem:[#allocation12 + $0x28] sm:$0xff]   ;;  %v1674_v50 = vld [vmem:[#allocation12 + $0x30] sm:$0xff]   ;;  %p2558_p3 = scmp.ne.s32.totalorder %s2556_s17, 0  ;;  %p1944_p12 = scmp.lt.s32.totalorder %s1942_s16, %s1936_s10 }
 0x12f   : > { %v1675_v51 = vld [vmem:[#allocation12 + $0x38] sm:$0xff]   ;;  %v1676_v52 = vld [vmem:[#allocation15] sm:$0xff]   ;;  %v1677_v53 = vld [vmem:[#allocation15 + $0x8] sm:$0xff]  }
 0x130   : > { %v1678_v54 = vld [vmem:[#allocation15 + $0x10] sm:$0xff]   ;;  %v1679_v55 = vld [vmem:[#allocation15 + $0x18] sm:$0xff]   ;;  %v1680_v56 = vld [vmem:[#allocation15 + $0x20] sm:$0xff]   ;;  %s2447_s27 = scalar_lea.hbm %s2557_s18, %s1394_s11  ;;  %p1938_p6 = pnand %p1937_p2, %p2558_p3 }
 0x131   : > { %1446 = vmatpush3.bf16.msra.mxu1 %v1661_v15  ;;  %v1360_v57 = vld [vmem:[#allocation11] ss:$0 sm:$0xff]  ;;  %v1681_v12 = vld [vmem:[#allocation15 + $0x28] sm:$0xff]   ;;  %v1682_v13 = vld [vmem:[#allocation15 + $0x30] sm:$0xff]   ;;  %p1945_p13 = por %p1944_p12, %p1943_p11 }
 0x132   : > { %1447 = vmatprep.subr.bf16.mxu1 %v1662_v18  ;;  %v1683_v14 = vld [vmem:[#allocation15 + $0x38] sm:$0xff]   ;;  %p1939_p5 = pneg %p1938_p6 }
 0x133   : > { %v1369_v15 = vld [vmem:[#allocation14] ss:$0 sm:$0xff] }
 0x134   : > { %p1946_p0 = pnand %p1945_p13, %p1939_p5 }
 0x135   : > { %1448 = vmatpush3.bf16.msra.mxu1 %v1662_v18 }
 0x136   : > { %1449 = vmatprep.subr.bf16.mxu1 %v1663_v19 }
 0x137   : > { %1440 = vmatmul.mubr.msk.bf16.vlgmr.msra.gmra.mrb[0].mxu0 %vm572_vm1, %v561_v20 }
 0x138   : > { %1464 = vmatpush3.bf16.msra.mxu0 %v1668_v25 }
 0x139   : > { %1450 = vmatpush3.bf16.msra.mxu1 %v1663_v19  ;;  %1465 = vmatprep.subr.bf16.mxu0 %v1669_v26 }
 0x13a   : > { %1451 = vmatprep.subr.bf16.mxu1 %v1664_v21 }
 0x13c   : > { %1466 = vmatpush3.bf16.msra.mxu0 %v1669_v26 }
 0x13d   : > { %1452 = vmatpush3.bf16.msra.mxu1 %v1664_v21  ;;  %1467 = vmatprep.subr.bf16.mxu0 %v1670_v27 }
 0x13e   : > { %1453 = vmatprep.subr.bf16.mxu1 %v1665_v22 }
 0x140   : > { %1468 = vmatpush3.bf16.msra.mxu0 %v1670_v27 }
 0x141   : > { %1454 = vmatpush3.bf16.msra.mxu1 %v1665_v22  ;;  %1469 = vmatprep.subr.bf16.mxu0 %v1671_v28 }
 0x142   : > { %1455 = vmatprep.subr.bf16.mxu1 %v1666_v23 }
 0x144   : > { %1470 = vmatpush3.bf16.msra.mxu0 %v1671_v28 }
 0x145   : > { %1456 = vmatpush3.bf16.msra.mxu1 %v1666_v23  ;;  %1471 = vmatprep.subr.bf16.mxu0 %v1672_v29 }
 0x146   : > { %1457 = vmatprep.subr.bf16.mxu1 %v1667_v24 }
 0x148   : > { %1472 = vmatpush3.bf16.msra.mxu0 %v1672_v29 }
 0x149   : > { %1458 = vmatpush3.bf16.msra.mxu1 %v1667_v24  ;;  %1473 = vmatprep.subr.bf16.mxu0 %v1673_v49 }
 0x14a   : > { %1483 = vmatprep.subr.bf16.mxu1 %v1676_v52 }
 0x14c   : > { %1474 = vmatpush3.bf16.msra.mxu0 %v1673_v49 }
 0x14d   : > { %1475 = vmatprep.subr.bf16.mxu0 %v1674_v50 }
 0x150   : > { %1476 = vmatpush3.bf16.msra.mxu0 %v1674_v50 }
 0x151   : > { %1477 = vmatprep.subr.bf16.mxu0 %v1675_v51 }
 0x154   : > { %1478 = vmatpush3.bf16.msra.mxu0 %v1675_v51 }
 0x20a   : > { %v1441_v31 = vpop.f32.mrb[0].mxu0 }
 0x20b   : > { %v699_v32 = vadd.f32 %v1441_v31, %v1359_v30  ;;  %v675_v33 = vpop.f32.mrb[1].mxu0 }
 0x20c   : > { %v697_v34 = vadd.f32 %v1359_v30, %v675_v33  ;;  %v1442_v35 = vpop.f32.mrb[2].mxu0 }
 0x20d   : > { %v707_v36 = vmul.f32 0.01, %v699_v32  ;;  %v700_v37 = vadd.f32 %v1442_v35, %v1359_v30  ;;  %v678_v38 = vpop.f32.mrb[3].mxu0  ;;  %vm703_vm2 = vcmp.gt.f32.partialorder %v699_v32, 0.0 }
 0x20e   : > { %v705_v39 = vmul.f32 0.01, %v697_v34  ;;  %v698_v40 = vadd.f32 %v1359_v30, %v678_v38  ;;  %vm701_vm4 = vcmp.gt.f32.partialorder %v697_v34, 0.0 }
 0x20f   : > { %vm704_vm3 = vcmp.gt.f32.partialorder %v700_v37, 0.0  ;;  %v708_v41 = vmul.f32 0.01, %v700_v37  ;;  %v711_v43 = vsel %vm703_vm2, %v699_v32, %v707_v36  ;;  %v1115_v36 = vld [vmem:[#allocation18] sm:$0x1]  ;;  %vm1144_vm2 = vcmask 7168  }
 0x210   : > { %v706_v42 = vmul.f32 0.01, %v698_v40  ;;  %vm702_vm5 = vcmp.gt.f32.partialorder %v698_v40, 0.0  ;;  %v709_v45 = vsel %vm701_vm4, %v697_v34, %v705_v39  ;;  %v1117_v34 = vlaneseq }
 0x211   : > { %v712_v44 = vsel %vm704_vm3, %v700_v37, %v708_v41  ;;  %v1378_v37 = vld [vmem:[#allocation17] ss:$0 sm:$0xff]  ;;  %v1116_v38 = vunpack.c.l.bf16 %v1115_v36 }
 0x212   : > { %v710_v46 = vsel %vm702_vm5, %v698_v40, %v706_v42  ;;  %v714_v47 = vpack.c.bf16 %v712_v44, %v711_v43  ;;  %v1118_v35 = vshrl.u32 %v1117_v34, 7 }
 0x213   : > { %v713_v48 = vpack.c.bf16 %v710_v46, %v709_v45 }
 0x214   : > { %v1119_v39 = vsub.s32 0, %v1118_v35 }
 0x215   : > { %1459 = vmatprep.mubr.bf16.mxu1 %v713_v48 }
 0x216   : > { %1460 = vmatmul.mubr.bf16.vlgmr.msra.gmra.mrb[0].mxu1 %v714_v47  ;;  %v1120_v45 = vrot.slane %v1116_v38, %v1119_v39 }
 0x217   : > { %1484 = vmatpush3.bf16.msra.mxu1 %v1676_v52 }
 0x218   : > { %1485 = vmatprep.subr.bf16.mxu1 %v1677_v53 }
 0x21b   : > { %1486 = vmatpush3.bf16.msra.mxu1 %v1677_v53 }
 0x21c   : > { %1487 = vmatprep.subr.bf16.mxu1 %v1678_v54 }
 0x21f   : > { %1488 = vmatpush3.bf16.msra.mxu1 %v1678_v54 }
 0x220   : > { %1489 = vmatprep.subr.bf16.mxu1 %v1679_v55 }
 0x223   : > { %1490 = vmatpush3.bf16.msra.mxu1 %v1679_v55 }
 0x224   : > { %1491 = vmatprep.subr.bf16.mxu1 %v1680_v56 }
 0x227   : > { %1492 = vmatpush3.bf16.msra.mxu1 %v1680_v56 }
 0x228   : > { %1493 = vmatprep.subr.bf16.mxu1 %v1681_v12 }
 0x22b   : > { %1494 = vmatpush3.bf16.msra.mxu1 %v1681_v12 }
 0x22c   : > { %1495 = vmatprep.subr.bf16.mxu1 %v1682_v13 }
 0x22f   : > { %1496 = vmatpush3.bf16.msra.mxu1 %v1682_v13 }
 0x230   : > { %1497 = vmatprep.subr.bf16.mxu1 %v1683_v14 }
 0x233   : > { %1498 = vmatpush3.bf16.msra.mxu1 %v1683_v14 }
 0x2e9   : > { %v1461_v58 = vpop.f32.mrb[0].mxu1 }
 0x2ea   : > { %v829_v59 = vadd.f32 %v1461_v58, %v1360_v57  ;;  %v820_v60 = vpop.f32.mrb[1].mxu1 }
 0x2eb   : > { %v821_v61 = vadd.f32 %v1360_v57, %v820_v60  ;;  %v1462_v62 = vpop.f32.mrb[2].mxu1 }
 0x2ec   : > { %v841_v63 = vmul.f32 0.01, %v829_v59  ;;  %v832_v0 = vadd.f32 %v1462_v62, %v1360_v57  ;;  %v823_v1 = vpop.f32.mrb[3].mxu1  ;;  %vm837_vm6 = vcmp.gt.f32.partialorder %v829_v59, 0.0 }
 0x2ed   : > { %v839_v2 = vmul.f32 0.01, %v821_v61  ;;  %v824_v3 = vadd.f32 %v1360_v57, %v823_v1  ;;  %vm835_vm7 = vcmp.gt.f32.partialorder %v821_v61, 0.0 }
 0x2ee   : > { %vm838_vm8 = vcmp.gt.f32.partialorder %v832_v0, 0.0  ;;  %v842_v4 = vmul.f32 0.01, %v832_v0  ;;  %v845_v6 = vsel %vm837_vm6, %v829_v59, %v841_v63 }
 0x2ef   : > { %vm836_vm9 = vcmp.gt.f32.partialorder %v824_v3, 0.0  ;;  %v840_v5 = vmul.f32 0.01, %v824_v3  ;;  %v843_v9 = vsel %vm835_vm7, %v821_v61, %v839_v2  ;;  %v1387_v61 = vld [vmem:[#allocation2] ss:$0 sm:$0xff] }
 0x2f0   : > { %v846_v7 = vsel %vm838_vm8, %v832_v0, %v842_v4 }
 0x2f1   : > { %v848_v8 = vpack.c.bf16 %v846_v7, %v845_v6  ;;  %v844_v10 = vsel %vm836_vm9, %v824_v3, %v840_v5 }
 0x2f2   : > { %v847_v11 = vpack.c.bf16 %v844_v10, %v843_v9 }
 0x2f4   : > { %1479 = vmatprep.mubr.bf16.mxu0 %v847_v11 }
 0x2f5   : > { %1480 = vmatmul.mubr.bf16.vlgmr.msra.gmra.mrb[4].mxu0 %v848_v8 }
 0x3c8   : > { %v1481_v16 = vpop.f32.mrb[4].mxu0 }
 0x3c9   : > { %v963_v17 = vadd.f32 %v1481_v16, %v1369_v15  ;;  %v954_v18 = vpop.f32.mrb[5].mxu0 }
 0x3ca   : > { %v955_v19 = vadd.f32 %v1369_v15, %v954_v18  ;;  %v1482_v20 = vpop.f32.mrb[6].mxu0 }
 0x3cb   : > { %v975_v21 = vmul.f32 0.01, %v963_v17  ;;  %v966_v22 = vadd.f32 %v1482_v20, %v1369_v15  ;;  %v957_v23 = vpop.f32.mrb[7].mxu0  ;;  %vm971_vm10 = vcmp.gt.f32.partialorder %v963_v17, 0.0 }
 0x3cc   : > { %v973_v24 = vmul.f32 0.01, %v955_v19  ;;  %v958_v25 = vadd.f32 %v1369_v15, %v957_v23  ;;  %vm969_vm11 = vcmp.gt.f32.partialorder %v955_v19, 0.0 }
 0x3cd   : > { %vm972_vm12 = vcmp.gt.f32.partialorder %v966_v22, 0.0  ;;  %v976_v26 = vmul.f32 0.01, %v966_v22  ;;  %v979_v28 = vsel %vm971_vm10, %v963_v17, %v975_v21 }
 0x3ce   : > { %vm970_vm13 = vcmp.gt.f32.partialorder %v958_v25, 0.0  ;;  %v974_v27 = vmul.f32 0.01, %v958_v25  ;;  %v977_v31 = vsel %vm969_vm11, %v955_v19, %v973_v24 }
 0x3cf   : > { %v980_v29 = vsel %vm972_vm12, %v966_v22, %v976_v26 }
 0x3d0   : > { %v982_v30 = vpack.c.bf16 %v980_v29, %v979_v28  ;;  %v978_v32 = vsel %vm970_vm13, %v958_v25, %v974_v27 }
 0x3d1   : > { %v981_v33 = vpack.c.bf16 %v978_v32, %v977_v31 }
 0x3d3   : > { %1499 = vmatprep.mubr.bf16.mxu1 %v981_v33 }
 0x3d4   : > { %1500 = vmatmul.mubr.bf16.vlgmr.msra.gmra.mrb[4].mxu1 %v982_v30 }
 0x4a7   : > { %v1501_v40 = vpop.f32.mrb[4].mxu1 }
 0x4a8   : > { %v1097_v41 = vadd.f32 %v1501_v40, %v1378_v37  ;;  %v1088_v42 = vpop.f32.mrb[5].mxu1 }
 0x4a9   : > { %v1089_v43 = vadd.f32 %v1378_v37, %v1088_v42  ;;  %v1502_v44 = vpop.f32.mrb[6].mxu1 }
 0x4aa   : > { %v1109_v46 = vmul.f32 0.01, %v1097_v41  ;;  %v1100_v47 = vadd.f32 %v1502_v44, %v1378_v37  ;;  %v1091_v48 = vpop.f32.mrb[7].mxu1  ;;  %vm1105_vm14 = vcmp.gt.f32.partialorder %v1097_v41, 0.0 }
 0x4ab   : > { %v1107_v49 = vmul.f32 0.01, %v1089_v43  ;;  %v1092_v50 = vadd.f32 %v1378_v37, %v1091_v48  ;;  %vm1103_vm15 = vcmp.gt.f32.partialorder %v1089_v43, 0.0 }
 0x4ac   : > { %v1110_v51 = vmul.f32 0.01, %v1100_v47  ;;  %v1113_v52 = vsel %vm1105_vm14, %v1097_v41, %v1109_v46  ;;  %vm1106_vm0 = vcmp.gt.f32.partialorder %v1100_v47, 0.0 }
 0x4ad   : > { %v1108_v53 = vmul.f32 0.01, %v1092_v50  ;;  %v1123_v54 = vmul.f32 %v1120_v45, %v1113_v52  ;;  %v1111_v55 = vsel %vm1103_vm15, %v1089_v43, %v1107_v49  ;;  %vm1104_vm1 = vcmp.gt.f32.partialorder %v1092_v50, 0.0 }
 0x4ae   : > { %v1121_v56 = vmul.f32 %v1120_v45, %v1111_v55  ;;  %v1114_v57 = vsel %vm1106_vm0, %v1100_v47, %v1110_v51 }
 0x4af   : > { %1129 = vadd.xlane.f32.xlu1 %v1123_v54  ;;  %v1112_v58 = vsel %vm1104_vm1, %v1092_v50, %v1108_v53  ;;  %v1124_v59 = vmul.f32 %v1120_v45, %v1114_v57 }
 0x4b0   : > { %1125 = vadd.xlane.f32.xlu0 %v1121_v56  ;;  %v1122_v60 = vmul.f32 %v1120_v45, %v1112_v58 }
 0x4b3   : > { %1131 = vadd.xlane.f32.xlu1 %v1124_v59 }
 0x4b4   : > { %1127 = vadd.xlane.f32.xlu0 %v1122_v60 }
 0x53c   : > { %v1130_v62 = vpop.xlane.xlu1 %1129 }
 0x53d   : > { %v1142_v63 = vadd.f32 %v1387_v61, %v1130_v62  ;;  %v1126_v0 = vpop.xlane.xlu0 %1125 }
 0x53e   : > { %v1140_v1 = vadd.f32 %v1387_v61, %v1126_v0 }
 0x53f   : > { %1147 = vst.msk [vmem:[%s552_s14 + $0x10] sm:$0xff] %vm1144_vm2, %v1142_v63 }
 0x540   : > { %1145 = vst.msk [vmem:[%s552_s14] sm:$0xff] %vm1144_vm2, %v1140_v1  ;;  %v1132_v2 = vpop.xlane.xlu1 %1131 }
 0x541   : > { %v1143_v3 = vadd.f32 %v1387_v61, %v1132_v2  ;;  %v1128_v4 = vpop.xlane.xlu0 %1127 }
 0x542   : > { %v1141_v5 = vadd.f32 %v1387_v61, %v1128_v4 }
 0x543   : > { %1148 = vst.msk [vmem:[%s552_s14 + $0x18] sm:$0xff] %vm1144_vm2, %v1143_v3 }
 0x544   : > { %1146 = vst.msk [vmem:[%s552_s14 + $0x8] sm:$0xff] %vm1144_vm2, %v1141_v5 }
 0x545   : > { %1949 = shalt.err (!%p1946_p0)
}
 0x546   : > { %s1950_s24 = scalar_lea.hbm %s2447_s27, 512  ;;  %s1954_s23 = scalar_lea.hbm %s2557_s18, 1024 }
 0x547   : > { %p1951_p7 = scmp.ne.s32.totalorder %s2447_s27, %s1950_s24  ;;  %p1955_p10 = scmp.lt.u32.totalorder %s2447_s27, %s2557_s18 }
 0x548   : > { %p1956_p1 = scmp.lt.u32.totalorder %s1954_s23, %s1950_s24  ;;  %p1958_p6 = scmp.lt.u32.totalorder %s1950_s24, %s2447_s27 }
 0x549   : > { %p1952_p8 = pnand %p1951_p7, %p2558_p3 }
 0x54a   : > { %p1957_p2 = por %p1956_p1, %p1955_p10 }
 0x54b   : > { %p1953_p9 = pneg %p1952_p8 }
 0x54c   : > { %p1959_p5 = por %p1958_p6, %p1957_p2 }
 0x54e   : > { %p1960_p11 = pnand %p1959_p5, %p1953_p9 }
 0x550   : > { %1963 = shalt.err (!%p1960_p11)
}
 0x551   : > { %s2044_s14 = smov 128   ;;  %s2045_s11 = smov 8  }
 0x552   : > { %1554 = dma.vmem_to_hbm [thread:$0]  (%p2558_p3), %s2441_s29, 512, %s2447_s27, %s1150_s20, %s2044_s14, %s2044_s14, %s2045_s11  }
 0x553 PF: > { %s2559_s25 = sld [smem:[#allocation31_spill]]  ;;  %s2560_s15 = sld [smem:[#allocation38_spill]] }
 0x559   : > { %s1178_s10 = sand.u32 1, %s2559_s25   ;;  %p2561_p12 = scmp.ne.s32.totalorder %s2560_s15, 0 }
 0x55a   : > { %s1179_s30 = scalar_lea.sflag [#allocation5], %s1178_s10 }
 0x55b   : > { %p1585_p13 = pnand %p1333_p4, %p2561_p12 }
 0x55d   : > { %2005 = dma.done.wait (!%p1585_p13), %s1179_s30, 512  }
 0x55e   : > { %2007 = vsyncadd (!%p1585_p13), %s1179_s30, 4294966784  ;;  %s2562_s22 = sld [smem:[#allocation34_spill]]  ;;  %s2563_s19 = sld [smem:[#allocation32_spill]] }
 0x55f   : > { %s2564_s16 = sld [smem:[#allocation35_spill]]  ;;  %s2565_s20 = smov %s2018_s21 }
 0x564   : > { %p31_p0 = scmp.ge.s32.totalorder %s2562_s22, 4  }
 0x565   : > { %s2566_s21 = smov %s2564_s16 }
 0x566   :  { %33 = sbr.rel (!%p31_p0) target bundleno = 13 (0xd), region = 152 }
 0x56d   :  { %1184 = vsyncpa [#allocation4], 1 }
 0x56e   :  { %1186 = vsyncpa [#allocation4 + $0x1], 1 }
 0x56f   :  { %1187 = vsyncpa [#allocation7], 1 }
 0x570   :  { %1188 = vsyncpa [#allocation10], 1 }
 0x571   :  { %1189 = vsyncpa [#allocation13], 1 }
 0x572   :  { %1190 = vsyncpa [#allocation16], 1 }
 0x573   :  { %1191 = vsyncpa [#allocation19], 1 }
 0x574   :  { %1192 = vsyncpa [#allocation5], 1 }
 0x575   :  { %1194 = vsyncpa [#allocation5 + $0x1], 1 }

</bundles_post_ra>
